<compile_context>
chip_gen: v6e
topology: v6e:2x2x1
jax: 0.10.0
libtpu: 0.0.40
codegen_flags: <defaults>
</compile_context>

<pallas_src>
import jax
import jax.numpy as jnp
from jax.experimental import pallas as pl
from jax.experimental.pallas import tpu as pltpu


_MAX_BLOCK_B = 512                # ~85% of HBM roofline; safe VMEM everywhere
_VMEM_ROW_BUDGET = 20 * 1024 * 1024


def _round_up(x, m):
    return ((x + m - 1) // m) * m


def _choose_block_b(batch, input_dim, lat_pad):
    """Adaptive batch tile: big tiles, little padding waste, >=2 tiles (v7x)."""
    # Rows allowed by a conservative VMEM budget (x f32 + recon bf16 dominate,
    # both double-buffered, plus eps/mu/logvar streams).
    bytes_per_row = 2 * (input_dim * (4 + 2) + 3 * lat_pad * 4)
    vmem_rows = max(8, _VMEM_ROW_BUDGET // bytes_per_row)
    max_block = max(8, min(_MAX_BLOCK_B, (vmem_rows // 8) * 8))

    if batch <= max_block and batch % 8 != 0:
        # One full-batch tile: block dim == array dim, so the (8,128) sublane
        # rule is satisfied with zero padding and zero masked rows.
        return batch
    n_tiles = max(1, pl.cdiv(batch, max_block))
    if n_tiles == 1 and batch >= 16:
        n_tiles = 2                      # give both v7x TensorCores a tile
    return min(max_block, _round_up(pl.cdiv(batch, n_tiles), 8))


def _vae_kernel(x_ref, eps_ref,
                w1_ref, b1_ref,
                w2m_ref, b2m_ref, w2l_ref, b2l_ref,
                w3_ref, b3_ref, w4_ref, b4_ref,
                recon_ref, mu_ref, logvar_ref):
    """One batch tile of: encoder -> reparameterize -> decoder."""
    # ----- encoder: Linear(D,H) -> ReLU -> split Linear(H,L) heads -----
    x = x_ref[...].astype(jnp.bfloat16)          # in-kernel cast (no wrapper repack)
    h1 = jnp.dot(x, w1_ref[...], preferred_element_type=jnp.float32) + b1_ref[...]
    h1 = jnp.maximum(h1, 0.0).astype(jnp.bfloat16)

    mu = jnp.dot(h1, w2m_ref[...], preferred_element_type=jnp.float32) + b2m_ref[...]
    logvar = jnp.dot(h1, w2l_ref[...], preferred_element_type=jnp.float32) + b2l_ref[...]

    # ----- reparameterize: z = mu + eps * exp(logvar / 2) -----
    z = mu + eps_ref[...] * jnp.exp(logvar * 0.5)

    # ----- decoder: Linear(L,H) -> ReLU -> Linear(H,D) -> Sigmoid -----
    d1 = jnp.dot(z.astype(jnp.bfloat16), w3_ref[...],
                 preferred_element_type=jnp.float32) + b3_ref[...]
    d1 = jnp.maximum(d1, 0.0).astype(jnp.bfloat16)
    logits = jnp.dot(d1, w4_ref[...], preferred_element_type=jnp.float32) + b4_ref[...]
    # sigmoid via EUP exp + approximate reciprocal (VALU stays free)
    recon_ref[...] = pl.reciprocal(1.0 + jnp.exp(-logits),
                                   approx=True).astype(recon_ref.dtype)

    mu_ref[...] = mu
    logvar_ref[...] = logvar


def prepare_params(params, latent_dim):
    """One-time weight prep (hoisted out of the forward): bf16 casts plus
    zero-padding of hidden_dim and the latent heads to 128 lanes."""
    (w1, b1), (w2, b2), (w3, b3), (w4, b4) = params
    f32, bf16 = jnp.float32, jnp.bfloat16
    input_dim, hidden_dim = w1.shape
    hid_pad = _round_up(hidden_dim, 128)
    lat_pad = _round_up(latent_dim, 128)

    b1 = jnp.asarray(b1, f32).reshape(1, -1)
    b2 = jnp.asarray(b2, f32).reshape(1, -1)
    b3 = jnp.asarray(b3, f32).reshape(1, -1)
    b4 = jnp.asarray(b4, f32).reshape(1, -1)

    w1_p = jnp.zeros((input_dim, hid_pad), bf16).at[:, :hidden_dim].set(w1.astype(bf16))
    b1_p = jnp.zeros((1, hid_pad), f32).at[:, :hidden_dim].set(b1)

    w2_mu = jnp.zeros((hid_pad, lat_pad), bf16).at[:hidden_dim, :latent_dim].set(
        w2[:, :latent_dim].astype(bf16))
    w2_lv = jnp.zeros((hid_pad, lat_pad), bf16).at[:hidden_dim, :latent_dim].set(
        w2[:, latent_dim:].astype(bf16))
    b2_mu = jnp.zeros((1, lat_pad), f32).at[:, :latent_dim].set(b2[:, :latent_dim])
    b2_lv = jnp.zeros((1, lat_pad), f32).at[:, :latent_dim].set(b2[:, latent_dim:])

    w3_p = jnp.zeros((lat_pad, hid_pad), bf16).at[:latent_dim, :hidden_dim].set(
        w3.astype(bf16))
    b3_p = jnp.zeros((1, hid_pad), f32).at[:, :hidden_dim].set(b3)

    w4_p = jnp.zeros((hid_pad, input_dim), bf16).at[:hidden_dim, :].set(w4.astype(bf16))
    b4_p = b4

    return dict(w1=w1_p, b1=b1_p,
                w2_mu=w2_mu, b2_mu=b2_mu, w2_lv=w2_lv, b2_lv=b2_lv,
                w3=w3_p, b3=b3_p, w4=w4_p, b4=b4_p,
                input_dim=input_dim, hidden_dim=hidden_dim,
                latent_dim=latent_dim, hid_pad=hid_pad, lat_pad=lat_pad)


def vae_forward(x, eps, prepped, *, block_b=None, recon_dtype=jnp.bfloat16):
    """x: (B, C, H, W) float32 NCHW; eps: (B, latent_dim) standard normal.
    Returns (recon_x, mu, logvar); recon_x is bf16 (cast up only if needed)."""
    org_shape = x.shape
    batch = org_shape[0]
    x_flat = x.reshape(batch, -1)               # metadata-only reshape, stays f32
    input_dim = x_flat.shape[1]
    assert input_dim == prepped["input_dim"], "x does not match prepared params"
    latent_dim = prepped["latent_dim"]
    lat_pad = prepped["lat_pad"]
    f32 = jnp.float32

    if block_b is None:
        block_b = _choose_block_b(batch, input_dim, lat_pad)
    elif block_b >= batch:
        block_b = batch
    elif block_b % 8 != 0:
        block_b = _round_up(block_b, 8)         # guard the (8,128) sublane rule
    grid = (pl.cdiv(batch, block_b),)           # partial last tile is masked by Pallas

    # eps padded to the 128-lane latent slab (tiny: lat_pad f32 per row).
    eps_pad = jnp.zeros((batch, lat_pad), f32).at[:, :latent_dim].set(eps.astype(f32))

    def row_spec(cols):
        # batch-tiled operand: block index advances with the grid step
        return pl.BlockSpec((block_b, cols), lambda i: (i, 0))

    def resident(arr):
        # weights/biases: same block every step -> stay VMEM-resident
        return pl.BlockSpec(arr.shape, lambda i: (0, 0))

    weights = (prepped["w1"], prepped["b1"],
               prepped["w2_mu"], prepped["b2_mu"],
               prepped["w2_lv"], prepped["b2_lv"],
               prepped["w3"], prepped["b3"],
               prepped["w4"], prepped["b4"])

    recon_p, mu_p, logvar_p = pl.pallas_call(
        _vae_kernel,
        grid=grid,
        out_shape=(
            jax.ShapeDtypeStruct((batch, input_dim), recon_dtype),
            jax.ShapeDtypeStruct((batch, lat_pad), f32),
            jax.ShapeDtypeStruct((batch, lat_pad), f32),
        ),
        in_specs=[row_spec(input_dim), row_spec(lat_pad)]
                + [resident(w) for w in weights],
        out_specs=(
            row_spec(input_dim),                 # recon (bf16, lane-dense)
            row_spec(lat_pad),                   # mu    (lane-dense)
            row_spec(lat_pad),                   # logvar(lane-dense)
        ),
        compiler_params=pltpu.CompilerParams(
            dimension_semantics=("parallel",),
            vmem_limit_bytes=32 * 1024 * 1024),
    )(x_flat, eps_pad, *weights)

    recon_x = recon_p.reshape(org_shape)
    mu = mu_p[:, :latent_dim]
    logvar = logvar_p[:, :latent_dim]
    return recon_x, mu, logvar


def init_params(key, input_dim, hidden_dim, latent_dim):
    """Deterministic synthetic parameters, (in, out) layout; biases (1, out)."""
    ks = jax.random.split(key, 8)

    def lin(kw, kb, fan_in, fan_out):
        bound = 1.0 / jnp.sqrt(fan_in)
        w = jax.random.uniform(kw, (fan_in, fan_out), jnp.float32, -bound, bound)
        b = jax.random.uniform(kb, (1, fan_out), jnp.float32, -bound, bound)
        return w, b

    p_enc1 = lin(ks[0], ks[1], input_dim, hidden_dim)
    p_enc2 = lin(ks[2], ks[3], hidden_dim, 2 * latent_dim)
    p_dec1 = lin(ks[4], ks[5], latent_dim, hidden_dim)
    p_dec2 = lin(ks[6], ks[7], hidden_dim, input_dim)
    return (p_enc1, p_enc2, p_dec1, p_dec2)


if __name__ == "__main__":
    # Small shapes consistent with the module's forward (NCHW input, flattened).
    B, C, H, W = 2, 4, 16, 16
    input_dim = C * H * W          # 1024
    hidden_dim = 32
    latent_dim = 16

    key = jax.random.PRNGKey(0)
    k_x, k_eps, k_params = jax.random.split(key, 3)

    x = jax.random.uniform(k_x, (B, C, H, W), jnp.float32)
    # torch.randn_like(mu) is replaced by an externally sampled eps (deterministic).
    eps = jax.random.normal(k_eps, (B, latent_dim), jnp.float32)
    params = init_params(k_params, input_dim, hidden_dim, latent_dim)
    prepped = prepare_params(params, latent_dim)   # one-time weight prep (hoisted)

    recon_x, mu, logvar = vae_forward(x, eps, prepped)
    jax.block_until_ready((recon_x, mu, logvar))

    assert recon_x.shape == x.shape
    assert mu.shape == (B, latent_dim)
    assert logvar.shape == (B, latent_dim)

    # Cross-check against a pure-JAX reference using the same bf16 MXU casts.
    bf16 = jnp.bfloat16
    xf = x.reshape(B, -1)
    (w1, b1), (w2, b2), (w3, b3), (w4, b4) = params
    h1 = jnp.maximum(jnp.dot(xf.astype(bf16), w1.astype(bf16),
                             preferred_element_type=jnp.float32) + b1, 0.0)
    h1b = h1.astype(bf16)
    mu_ref = jnp.dot(h1b, w2[:, :latent_dim].astype(bf16),
                     preferred_element_type=jnp.float32) + b2[:, :latent_dim]
    lv_ref = jnp.dot(h1b, w2[:, latent_dim:].astype(bf16),
                     preferred_element_type=jnp.float32) + b2[:, latent_dim:]
    z_ref = mu_ref + eps * jnp.exp(lv_ref * 0.5)
    d1_ref = jnp.maximum(jnp.dot(z_ref.astype(bf16), w3.astype(bf16),
                                 preferred_element_type=jnp.float32) + b3, 0.0)
    logits_ref = jnp.dot(d1_ref.astype(bf16), w4.astype(bf16),
                         preferred_element_type=jnp.float32) + b4
    recon_ref = jax.nn.sigmoid(logits_ref).reshape(x.shape)

    assert jnp.allclose(mu, mu_ref, atol=3e-3)
    assert jnp.allclose(logvar, lv_ref, atol=3e-3)
    assert jnp.allclose(recon_x.astype(jnp.float32), recon_ref, atol=1e-2)

    print("KERNEL_OK")
</pallas_src>

<mosaic_0001>
module attributes {stable_mosaic.version = 11 : i64} {
  func.func @_vae_kernel(%arg0: i32, %arg1: memref<2x1024xf32, #tpu.memory_space<vmem>>, %arg2: memref<2x128xf32, #tpu.memory_space<vmem>>, %arg3: memref<1024x128xbf16, #tpu.memory_space<vmem>>, %arg4: memref<1x128xf32, #tpu.memory_space<vmem>>, %arg5: memref<128x128xbf16, #tpu.memory_space<vmem>>, %arg6: memref<1x128xf32, #tpu.memory_space<vmem>>, %arg7: memref<128x128xbf16, #tpu.memory_space<vmem>>, %arg8: memref<1x128xf32, #tpu.memory_space<vmem>>, %arg9: memref<128x128xbf16, #tpu.memory_space<vmem>>, %arg10: memref<1x128xf32, #tpu.memory_space<vmem>>, %arg11: memref<128x1024xbf16, #tpu.memory_space<vmem>>, %arg12: memref<1x1024xf32, #tpu.memory_space<vmem>>, %arg13: memref<2x1024xbf16, #tpu.memory_space<vmem>>, %arg14: memref<2x128xf32, #tpu.memory_space<vmem>>, %arg15: memref<2x128xf32, #tpu.memory_space<vmem>>) attributes {dimension_semantics = [#tpu.dimension_semantics<parallel>], iteration_bounds = array<i64: 1>, scalar_prefetch = 0 : i64, scratch_operands = 0 : i64, tpu.core_type = #tpu.core_type<tc>, window_params = [{transform_indices = @transform_0, window_bounds = array<i64: 2, 1024>}, {transform_indices = @transform_1, window_bounds = array<i64: 2, 128>}, {pipeline_mode = #tpu.pipeline_mode<synchronous>, transform_indices = @transform_2, window_bounds = array<i64: 1024, 128>}, {pipeline_mode = #tpu.pipeline_mode<synchronous>, transform_indices = @transform_3, window_bounds = array<i64: 1, 128>}, {pipeline_mode = #tpu.pipeline_mode<synchronous>, transform_indices = @transform_4, window_bounds = array<i64: 128, 128>}, {pipeline_mode = #tpu.pipeline_mode<synchronous>, transform_indices = @transform_5, window_bounds = array<i64: 1, 128>}, {pipeline_mode = #tpu.pipeline_mode<synchronous>, transform_indices = @transform_6, window_bounds = array<i64: 128, 128>}, {pipeline_mode = #tpu.pipeline_mode<synchronous>, transform_indices = @transform_7, window_bounds = array<i64: 1, 128>}, {pipeline_mode = #tpu.pipeline_mode<synchronous>, transform_indices = @transform_8, window_bounds = array<i64: 128, 128>}, {pipeline_mode = #tpu.pipeline_mode<synchronous>, transform_indices = @transform_9, window_bounds = array<i64: 1, 128>}, {pipeline_mode = #tpu.pipeline_mode<synchronous>, transform_indices = @transform_10, window_bounds = array<i64: 128, 1024>}, {pipeline_mode = #tpu.pipeline_mode<synchronous>, transform_indices = @transform_11, window_bounds = array<i64: 1, 1024>}, {transform_indices = @transform_12, window_bounds = array<i64: 2, 1024>}, {transform_indices = @transform_13, window_bounds = array<i64: 2, 128>}, {transform_indices = @transform_14, window_bounds = array<i64: 2, 128>}]} {
    %c0 = arith.constant 0 : index
    %c0_0 = arith.constant 0 : index
    %0 = vector.load %arg1[%c0, %c0_0] : memref<2x1024xf32, #tpu.memory_space<vmem>>, vector<2x1024xf32>
    %1 = arith.truncf %0 : vector<2x1024xf32> to vector<2x1024xbf16>
    %c0_1 = arith.constant 0 : index
    %c0_2 = arith.constant 0 : index
    %2 = vector.load %arg3[%c0_1, %c0_2] : memref<1024x128xbf16, #tpu.memory_space<vmem>>, vector<1024x128xbf16>
    %cst = arith.constant dense<0.000000e+00> : vector<2x128xf32>
    %3 = tpu.matmul %1, %2, %cst {dimension_numbers = #tpu.dot_dimension_numbers<[1], [0], [0], [1], [0, 0, 1, 1], [], []>} : vector<2x1024xbf16>, vector<1024x128xbf16>, vector<2x128xf32> -> vector<2x128xf32>
    %c0_3 = arith.constant 0 : index
    %c0_4 = arith.constant 0 : index
    %4 = vector.load %arg4[%c0_3, %c0_4] : memref<1x128xf32, #tpu.memory_space<vmem>>, vector<1x128xf32>
    %5 = vector.broadcast %4 : vector<1x128xf32> to vector<2x128xf32>
    %6 = arith.addf %3, %5 : vector<2x128xf32>
    %cst_5 = arith.constant 0.000000e+00 : f32
    %7 = vector.broadcast %cst_5 : f32 to vector<2x128xf32>
    %8 = arith.maximumf %6, %7 : vector<2x128xf32>
    %9 = arith.truncf %8 : vector<2x128xf32> to vector<2x128xbf16>
    %c0_6 = arith.constant 0 : index
    %c0_7 = arith.constant 0 : index
    %10 = vector.load %arg5[%c0_6, %c0_7] : memref<128x128xbf16, #tpu.memory_space<vmem>>, vector<128x128xbf16>
    %cst_8 = arith.constant dense<0.000000e+00> : vector<2x128xf32>
    %11 = tpu.matmul %9, %10, %cst_8 {dimension_numbers = #tpu.dot_dimension_numbers<[1], [0], [0], [1], [0, 0, 1, 1], [], []>} : vector<2x128xbf16>, vector<128x128xbf16>, vector<2x128xf32> -> vector<2x128xf32>
    %c0_9 = arith.constant 0 : index
    %c0_10 = arith.constant 0 : index
    %12 = vector.load %arg6[%c0_9, %c0_10] : memref<1x128xf32, #tpu.memory_space<vmem>>, vector<1x128xf32>
    %13 = vector.broadcast %12 : vector<1x128xf32> to vector<2x128xf32>
    %14 = arith.addf %11, %13 : vector<2x128xf32>
    %c0_11 = arith.constant 0 : index
    %c0_12 = arith.constant 0 : index
    %15 = vector.load %arg7[%c0_11, %c0_12] : memref<128x128xbf16, #tpu.memory_space<vmem>>, vector<128x128xbf16>
    %cst_13 = arith.constant dense<0.000000e+00> : vector<2x128xf32>
    %16 = tpu.matmul %9, %15, %cst_13 {dimension_numbers = #tpu.dot_dimension_numbers<[1], [0], [0], [1], [0, 0, 1, 1], [], []>} : vector<2x128xbf16>, vector<128x128xbf16>, vector<2x128xf32> -> vector<2x128xf32>
    %c0_14 = arith.constant 0 : index
    %c0_15 = arith.constant 0 : index
    %17 = vector.load %arg8[%c0_14, %c0_15] : memref<1x128xf32, #tpu.memory_space<vmem>>, vector<1x128xf32>
    %18 = vector.broadcast %17 : vector<1x128xf32> to vector<2x128xf32>
    %19 = arith.addf %16, %18 : vector<2x128xf32>
    %c0_16 = arith.constant 0 : index
    %c0_17 = arith.constant 0 : index
    %20 = vector.load %arg2[%c0_16, %c0_17] : memref<2x128xf32, #tpu.memory_space<vmem>>, vector<2x128xf32>
    %cst_18 = arith.constant 5.000000e-01 : f32
    %21 = vector.broadcast %cst_18 : f32 to vector<2x128xf32>
    %22 = arith.mulf %19, %21 : vector<2x128xf32>
    %23 = math.exp %22 : vector<2x128xf32>
    %24 = arith.mulf %20, %23 : vector<2x128xf32>
    %25 = arith.addf %14, %24 : vector<2x128xf32>
    %26 = arith.truncf %25 : vector<2x128xf32> to vector<2x128xbf16>
    %c0_19 = arith.constant 0 : index
    %c0_20 = arith.constant 0 : index
    %27 = vector.load %arg9[%c0_19, %c0_20] : memref<128x128xbf16, #tpu.memory_space<vmem>>, vector<128x128xbf16>
    %cst_21 = arith.constant dense<0.000000e+00> : vector<2x128xf32>
    %28 = tpu.matmul %26, %27, %cst_21 {dimension_numbers = #tpu.dot_dimension_numbers<[1], [0], [0], [1], [0, 0, 1, 1], [], []>} : vector<2x128xbf16>, vector<128x128xbf16>, vector<2x128xf32> -> vector<2x128xf32>
    %c0_22 = arith.constant 0 : index
    %c0_23 = arith.constant 0 : index
    %29 = vector.load %arg10[%c0_22, %c0_23] : memref<1x128xf32, #tpu.memory_space<vmem>>, vector<1x128xf32>
    %30 = vector.broadcast %29 : vector<1x128xf32> to vector<2x128xf32>
    %31 = arith.addf %28, %30 : vector<2x128xf32>
    %cst_24 = arith.constant 0.000000e+00 : f32
    %32 = vector.broadcast %cst_24 : f32 to vector<2x128xf32>
    %33 = arith.maximumf %31, %32 : vector<2x128xf32>
    %34 = arith.truncf %33 : vector<2x128xf32> to vector<2x128xbf16>
    %c0_25 = arith.constant 0 : index
    %c0_26 = arith.constant 0 : index
    %35 = vector.load %arg11[%c0_25, %c0_26] : memref<128x1024xbf16, #tpu.memory_space<vmem>>, vector<128x1024xbf16>
    %cst_27 = arith.constant dense<0.000000e+00> : vector<2x1024xf32>
    %36 = tpu.matmul %34, %35, %cst_27 {dimension_numbers = #tpu.dot_dimension_numbers<[1], [0], [0], [1], [0, 0, 1, 1], [], []>} : vector<2x128xbf16>, vector<128x1024xbf16>, vector<2x1024xf32> -> vector<2x1024xf32>
    %c0_28 = arith.constant 0 : index
    %c0_29 = arith.constant 0 : index
    %37 = vector.load %arg12[%c0_28, %c0_29] : memref<1x1024xf32, #tpu.memory_space<vmem>>, vector<1x1024xf32>
    %38 = vector.broadcast %37 : vector<1x1024xf32> to vector<2x1024xf32>
    %39 = arith.addf %36, %38 : vector<2x1024xf32>
    %cst_30 = arith.constant 0.000000e+00 : f32
    %40 = vector.broadcast %cst_30 : f32 to vector<2x1024xf32>
    %41 = arith.subf %40, %39 : vector<2x1024xf32>
    %42 = math.exp %41 : vector<2x1024xf32>
    %cst_31 = arith.constant 1.000000e+00 : f32
    %43 = vector.broadcast %cst_31 : f32 to vector<2x1024xf32>
    %44 = arith.addf %43, %42 : vector<2x1024xf32>
    %45 = tpu.reciprocal %44 {approx = true} : vector<2x1024xf32> -> vector<2x1024xf32>
    %46 = arith.truncf %45 : vector<2x1024xf32> to vector<2x1024xbf16>
    %c0_32 = arith.constant 0 : index
    %c0_33 = arith.constant 0 : index
    %47 = vector.load %arg13[%c0_32, %c0_33] : memref<2x1024xbf16, #tpu.memory_space<vmem>>, vector<2x1024xbf16>
    tpu.vector_store %arg13[%c0_32, %c0_33], %46 {strides = array<i32>} : memref<2x1024xbf16, #tpu.memory_space<vmem>>, vector<2x1024xbf16>,
    %c0_34 = arith.constant 0 : index
    %c0_35 = arith.constant 0 : index
    %48 = vector.load %arg14[%c0_34, %c0_35] : memref<2x128xf32, #tpu.memory_space<vmem>>, vector<2x128xf32>
    tpu.vector_store %arg14[%c0_34, %c0_35], %14 {strides = array<i32>} : memref<2x128xf32, #tpu.memory_space<vmem>>, vector<2x128xf32>,
    %c0_36 = arith.constant 0 : index
    %c0_37 = arith.constant 0 : index
    %49 = vector.load %arg15[%c0_36, %c0_37] : memref<2x128xf32, #tpu.memory_space<vmem>>, vector<2x128xf32>
    tpu.vector_store %arg15[%c0_36, %c0_37], %19 {strides = array<i32>} : memref<2x128xf32, #tpu.memory_space<vmem>>, vector<2x128xf32>,
    return
  }
  func.func @transform_0(%arg0: i32) -> (i32, i32) {
    %c0_i32 = arith.constant 0 : i32
    %c0_i32_0 = arith.constant 0 : i32
    return %arg0, %c0_i32 : i32, i32
  }
  func.func @transform_1(%arg0: i32) -> (i32, i32) {
    %c0_i32 = arith.constant 0 : i32
    %c0_i32_0 = arith.constant 0 : i32
    return %arg0, %c0_i32 : i32, i32
  }
  func.func @transform_2(%arg0: i32) -> (i32, i32) {
    %c0_i32 = arith.constant 0 : i32
    %c0_i32_0 = arith.constant 0 : i32
    %c0_i32_1 = arith.constant 0 : i32
    return %c0_i32, %c0_i32_0 : i32, i32
  }
  func.func @transform_3(%arg0: i32) -> (i32, i32) {
    %c0_i32 = arith.constant 0 : i32
    %c0_i32_0 = arith.constant 0 : i32
    %c0_i32_1 = arith.constant 0 : i32
    return %c0_i32, %c0_i32_0 : i32, i32
  }
  func.func @transform_4(%arg0: i32) -> (i32, i32) {
    %c0_i32 = arith.constant 0 : i32
    %c0_i32_0 = arith.constant 0 : i32
    %c0_i32_1 = arith.constant 0 : i32
    return %c0_i32, %c0_i32_0 : i32, i32
  }
  func.func @transform_5(%arg0: i32) -> (i32, i32) {
    %c0_i32 = arith.constant 0 : i32
    %c0_i32_0 = arith.constant 0 : i32
    %c0_i32_1 = arith.constant 0 : i32
    return %c0_i32, %c0_i32_0 : i32, i32
  }
  func.func @transform_6(%arg0: i32) -> (i32, i32) {
    %c0_i32 = arith.constant 0 : i32
    %c0_i32_0 = arith.constant 0 : i32
    %c0_i32_1 = arith.constant 0 : i32
    return %c0_i32, %c0_i32_0 : i32, i32
  }
  func.func @transform_7(%arg0: i32) -> (i32, i32) {
    %c0_i32 = arith.constant 0 : i32
    %c0_i32_0 = arith.constant 0 : i32
    %c0_i32_1 = arith.constant 0 : i32
    return %c0_i32, %c0_i32_0 : i32, i32
  }
  func.func @transform_8(%arg0: i32) -> (i32, i32) {
    %c0_i32 = arith.constant 0 : i32
    %c0_i32_0 = arith.constant 0 : i32
    %c0_i32_1 = arith.constant 0 : i32
    return %c0_i32, %c0_i32_0 : i32, i32
  }
  func.func @transform_9(%arg0: i32) -> (i32, i32) {
    %c0_i32 = arith.constant 0 : i32
    %c0_i32_0 = arith.constant 0 : i32
    %c0_i32_1 = arith.constant 0 : i32
    return %c0_i32, %c0_i32_0 : i32, i32
  }
  func.func @transform_10(%arg0: i32) -> (i32, i32) {
    %c0_i32 = arith.constant 0 : i32
    %c0_i32_0 = arith.constant 0 : i32
    %c0_i32_1 = arith.constant 0 : i32
    return %c0_i32, %c0_i32_0 : i32, i32
  }
  func.func @transform_11(%arg0: i32) -> (i32, i32) {
    %c0_i32 = arith.constant 0 : i32
    %c0_i32_0 = arith.constant 0 : i32
    %c0_i32_1 = arith.constant 0 : i32
    return %c0_i32, %c0_i32_0 : i32, i32
  }
  func.func @transform_12(%arg0: i32) -> (i32, i32) {
    %c0_i32 = arith.constant 0 : i32
    %c0_i32_0 = arith.constant 0 : i32
    return %arg0, %c0_i32 : i32, i32
  }
  func.func @transform_13(%arg0: i32) -> (i32, i32) {
    %c0_i32 = arith.constant 0 : i32
    %c0_i32_0 = arith.constant 0 : i32
    return %arg0, %c0_i32 : i32, i32
  }
  func.func @transform_14(%arg0: i32) -> (i32, i32) {
    %c0_i32 = arith.constant 0 : i32
    %c0_i32_0 = arith.constant 0 : i32
    return %arg0, %c0_i32 : i32, i32
  }
}

</mosaic_0001>

<bundles_post_ra>
// kernel: tpu_custom_call.1
= control target key start
LH: loop header
LB: loop body
LE: loop exit
PB: predicated region body
PF: predicated region fallthrough
CT: control target
= control target key end

     0   :  { %20 = vsyncpa [#allocation3], 0  ;;  %s2865_s0 = inlined_call_operand.hbm [shape: f32[2,1024], index: 0, kind: input, shape index: {}]   ;;  %s2866_s1 = inlined_call_operand.hbm [shape: f32[2,128], index: 1, kind: input, shape index: {}]   ;;  %s2867_s2 = inlined_call_operand.hbm [shape: bf16[1024,128], index: 2, kind: input, shape index: {}]   ;;  %s2868_s3 = inlined_call_operand.vmem [shape: f32[1,128], index: 3, kind: input, shape index: {}]   ;;  %s2869_s4 = inlined_call_operand.hbm [shape: bf16[128,128], index: 4, kind: input, shape index: {}]   ;;  %s2870_s5 = inlined_call_operand.vmem [shape: f32[1,128], index: 5, kind: input, shape index: {}]   ;;  %s2871_s6 = inlined_call_operand.hbm [shape: bf16[128,128], index: 6, kind: input, shape index: {}]   ;;  %s2872_s7 = inlined_call_operand.vmem [shape: f32[1,128], index: 7, kind: input, shape index: {}]   ;;  %s2873_s8 = inlined_call_operand.hbm [shape: bf16[128,128], index: 8, kind: input, shape index: {}]   ;;  %s2874_s9 = inlined_call_operand.vmem [shape: f32[1,128], index: 9, kind: input, shape index: {}]   ;;  %s2875_s10 = inlined_call_operand.hbm [shape: bf16[128,1024], index: 10, kind: input, shape index: {}]   ;;  %s2876_s11 = inlined_call_operand.vmem [shape: f32[1,1024], index: 11, kind: input, shape index: {}]   ;;  %s2877_s12 = inlined_call_operand.hbm [shape: bf16[2,1024], index: 12, kind: output, shape index: {0}]   ;;  %s2878_s13 = inlined_call_operand.hbm [shape: f32[2,128], index: 13, kind: output, shape index: {1}]   ;;  %s2879_s14 = inlined_call_operand.hbm [shape: f32[2,128], index: 14, kind: output, shape index: {2}]  }
   0x1   :  { %21 = vsyncpa [#allocation6], 0 }
   0x2   :  { %22 = vsyncpa [#allocation9], 0 }
   0x3   :  { %23 = vsyncpa [#allocation12], 0 }
   0x4   :  { %24 = vsyncpa [#allocation4], 0 }
   0x5   :  { %25 = vsyncpa [#allocation16], 0  ;;  %s2649_s29 = smov [#allocation5]  }
   0x6   :  { %s42_s30 = sshll.u32 %s2649_s29, 4  ;;  %s43_s30 = int_to_ptr.vmem [resolvable:$true] %s42_s30 }
   0x7   :  { %s2445_s15 = scalar_lea.vmem %s43_s30, 32  ;;  %p2450_p1 = scmp.lt.s32.totalorder %s43_s30, %s43_s30 }
   0x8   :  { %p2446_p0 = scmp.ne.s32.totalorder %s43_s30, %s2445_s15  ;;  %p2451_p2 = scmp.lt.s32.totalorder %s2445_s15, %s2445_s15 }
   0xa   :  { %p2452_p3 = por %p2451_p2, %p2450_p1 }
   0xc   :  { %p2453_p4 = pnand %p2452_p3, %p2446_p0 }
   0xe   :  { %2456 = shalt.err (!%p2453_p4)
}
   0xf   :  { %45 = dma.hbm_to_vmem [thread:$0]  %s2866_s1, 32, %s43_s30, [#allocation6]  }
  0x10   :  { %s2650_s18 = smov [#allocation8]   ;;  %s2651_s20 = smov [#allocation11]  }
  0x11   :  { %s65_s19 = sshll.u32 %s2650_s18, 4  ;;  %s93_s21 = sshll.u32 %s2651_s20, 4  ;;  %s66_s19 = int_to_ptr.vmem [resolvable:$true] %s65_s19  ;;  %s94_s21 = int_to_ptr.vmem [resolvable:$true] %s93_s21 }
  0x12   :  { %s2465_s22 = scalar_lea.vmem %s66_s19, 1024  ;;  %p2470_p6 = scmp.lt.s32.totalorder %s66_s19, %s66_s19 }
  0x13   :  { %p2466_p5 = scmp.ne.s32.totalorder %s66_s19, %s2465_s22  ;;  %p2471_p7 = scmp.lt.s32.totalorder %s2465_s22, %s2465_s22 }
  0x15   :  { %p2472_p8 = por %p2471_p7, %p2470_p6 }
  0x17   :  { %p2473_p9 = pnand %p2472_p8, %p2466_p5 }
  0x19   :  { %2476 = shalt.err (!%p2473_p9)
}
  0x1a   :  { %s2652_s23 = smov 64   ;;  %s2653_s24 = smov 4  }
  0x1b   :  { %71 = dma.hbm_to_vmem [thread:$0]  %s2869_s4, 1024, %s66_s19, [#allocation9], %s2652_s23, %s2652_s23, %s2653_s24  }
  0x1c   :  { %s2485_s1 = scalar_lea.vmem %s94_s21, 1024  ;;  %p2490_p11 = scmp.lt.s32.totalorder %s94_s21, %s94_s21 }
  0x1d   :  { %p2486_p10 = scmp.ne.s32.totalorder %s94_s21, %s2485_s1  ;;  %p2491_p12 = scmp.lt.s32.totalorder %s2485_s1, %s2485_s1 }
  0x1f   :  { %p2492_p13 = por %p2491_p12, %p2490_p11 }
  0x21   :  { %p2493_p0 = pnand %p2492_p13, %p2486_p10 }
  0x23   :  { %2496 = shalt.err (!%p2493_p0)
}
  0x24   :  { %99 = dma.hbm_to_vmem [thread:$0]  %s2873_s8, 1024, %s94_s21, [#allocation12], %s2652_s23, %s2652_s23, %s2653_s24  }
  0x25   :  { %s2654_s29 = smov [#allocation2]   ;;  %s2655_s15 = smov [#allocation7]  }
  0x26   :  { %s32_s30 = sshll.u32 %s2654_s29, 4  ;;  %s51_s4 = sshll.u32 %s2655_s15, 4  ;;  %s33_s30 = int_to_ptr.vmem [resolvable:$true] %s32_s30  ;;  %s52_s4 = int_to_ptr.vmem [resolvable:$true] %s51_s4 }
  0x27   :  { %s2505_s16 = scalar_lea.vmem %s33_s30, 256  ;;  %p2510_p2 = scmp.lt.s32.totalorder %s33_s30, %s33_s30 }
  0x28   :  { %p2506_p1 = scmp.ne.s32.totalorder %s33_s30, %s2505_s16  ;;  %p2511_p3 = scmp.lt.s32.totalorder %s2505_s16, %s2505_s16 }
  0x2a   :  { %p2512_p4 = por %p2511_p3, %p2510_p2 }
  0x2c   :  { %p2513_p5 = pnand %p2512_p4, %p2506_p1 }
  0x2e   :  { %2516 = shalt.err (!%p2513_p5)
}
  0x2f   :  { %35 = dma.hbm_to_vmem [thread:$0]  %s2865_s0, 256, %s33_s30, [#allocation3]  }
  0x30   :  { %s2525_s19 = scalar_lea.vmem %s52_s4, 8192  ;;  %p2530_p7 = scmp.lt.s32.totalorder %s52_s4, %s52_s4 }
  0x31   :  { %p2526_p6 = scmp.ne.s32.totalorder %s52_s4, %s2525_s19  ;;  %p2531_p8 = scmp.lt.s32.totalorder %s2525_s19, %s2525_s19 }
  0x33   :  { %p2532_p9 = por %p2531_p8, %p2530_p7 }
  0x35   :  { %p2533_p10 = pnand %p2532_p9, %p2526_p6 }
  0x37   :  { %2536 = shalt.err (!%p2533_p10)
}
  0x38   :  { %57 = dma.hbm_to_vmem [thread:$0]  %s2867_s2, 8192, %s52_s4, [#allocation6], %s2652_s23, %s2652_s23, %s2653_s24  }
  0x39   :  { %s2656_s21 = smov [#allocation10]   ;;  %s2657_s25 = smov [#allocation13]  }
  0x3a   :  { %s79_s22 = sshll.u32 %s2656_s21, 4  ;;  %s107_s0 = sshll.u32 %s2657_s25, 4  ;;  %s80_s22 = int_to_ptr.vmem [resolvable:$true] %s79_s22  ;;  %s108_s0 = int_to_ptr.vmem [resolvable:$true] %s107_s0 }
  0x3b   :  { %s2545_s26 = scalar_lea.vmem %s80_s22, 1024  ;;  %p2550_p12 = scmp.lt.s32.totalorder %s80_s22, %s80_s22 }
  0x3c   :  { %p2546_p11 = scmp.ne.s32.totalorder %s80_s22, %s2545_s26  ;;  %p2551_p13 = scmp.lt.s32.totalorder %s2545_s26, %s2545_s26 }
  0x3e   :  { %p2552_p0 = por %p2551_p13, %p2550_p12 }
  0x40   :  { %p2553_p1 = pnand %p2552_p0, %p2546_p11 }
  0x42   :  { %2556 = shalt.err (!%p2553_p1)
}
  0x43   :  { %85 = dma.hbm_to_vmem [thread:$0]  %s2871_s6, 1024, %s80_s22, [#allocation9], %s2652_s23, %s2652_s23, %s2653_s24  }
  0x44   :  { %s2565_s2 = scalar_lea.vmem %s108_s0, 8192  ;;  %p2570_p3 = scmp.lt.s32.totalorder %s108_s0, %s108_s0 }
  0x45   :  { %p2566_p2 = scmp.ne.s32.totalorder %s108_s0, %s2565_s2  ;;  %p2571_p4 = scmp.lt.s32.totalorder %s2565_s2, %s2565_s2 }
  0x47   :  { %p2572_p5 = por %p2571_p4, %p2570_p3 }
  0x49   :  { %p2573_p6 = pnand %p2572_p5, %p2566_p2 }
  0x4b   :  { %2576 = shalt.err (!%p2573_p6)
}
  0x4c   :  { %s2658_s28 = smov 512   ;;  %s2659_s29 = smov 32  }
  0x4d   :  { %113 = dma.hbm_to_vmem [thread:$0]  %s2875_s10, 8192, %s108_s0, [#allocation12], %s2658_s28, %s2658_s28, %s2659_s29  }
  0x4e   :  { %2637 = dma.done.wait [#allocation3], 256  }
  0x4f   :  { %2638 = vsyncadd [#allocation3], 4294967040 }
  0x50   :  { %2639 = dma.done.wait [#allocation6], 8224  }
  0x51   :  { %2640 = vsyncadd [#allocation6], 4294959072 }
  0x52   :  { %2641 = dma.done.wait [#allocation9], 2048  }
  0x53   :  { %2642 = vsyncadd [#allocation9], 4294965248 }
  0x54   :  { %2643 = dma.done.wait [#allocation12], 9216  }
  0x55   :  { %2644 = vsyncadd [#allocation12], 4294958080  ;;  %v2313_v0 = vld [vmem:[#allocation7 + $0x78] sm:$0xff]   ;;  %v2317_v4 = vld [vmem:[#allocation7 + $0x70] sm:$0xff]   ;;  %v2660_v22 = vmov 1983009808   ;;  %v146_v24 = vlaneseq }
  0x56   :  { %v2314_v1 = vld [vmem:[#allocation7 + $0xf8] sm:$0xff]   ;;  %2119 = vmatprep.subr.bf16.mxu0 %v2313_v0  ;;  %v2318_v5 = vld [vmem:[#allocation7 + $0xf0] sm:$0xff]   ;;  %v2321_v8 = vld [vmem:[#allocation7 + $0x68] sm:$0xff]   ;;  %v144_v23 = vunpack.c.l.s4 %v2660_v22  ;;  %vm2662_vm0 = vmmov 0  }
  0x57   :  { %v2315_v2 = vld [vmem:[#allocation7 + $0x38] sm:$0xff]   ;;  %2141 = vmatprep.subr.bf16.mxu1 %v2314_v1  ;;  %v2319_v6 = vld [vmem:[#allocation7 + $0x30] sm:$0xff]   ;;  %v2322_v9 = vld [vmem:[#allocation7 + $0xe8] sm:$0xff]   ;;  %v2776_v30 = vshrl.u32 %v146_v24, 7 }
  0x58   :  { %v2316_v3 = vld [vmem:[#allocation7 + $0xb8] sm:$0xff]   ;;  %2120 = vmatpush3.bf16.msra.mxu0 %v2315_v2  ;;  %v2320_v7 = vld [vmem:[#allocation7 + $0xb0] sm:$0xff]   ;;  %v2323_v10 = vld [vmem:[#allocation7 + $0x28] sm:$0xff]   ;;  %v145_v29 = vunpack.c.0.s8 %v144_v23 }
  0x59   :  { %2142 = vmatpush3.bf16.msra.mxu1 %v2316_v3  ;;  %2121 = vmatprep.subr.bf16.mxu0 %v2317_v4  ;;  %v2324_v11 = vld [vmem:[#allocation7 + $0xa8] sm:$0xff]   ;;  %v2325_v12 = vld [vmem:[#allocation7 + $0x60] sm:$0xff]   ;;  %v2329_v16 = vld [vmem:[#allocation7 + $0x58] sm:$0xff]  }
  0x5a   :  { %2143 = vmatprep.subr.bf16.mxu1 %v2318_v5  ;;  %v2326_v13 = vld [vmem:[#allocation7 + $0xe0] sm:$0xff]   ;;  %v2330_v17 = vld [vmem:[#allocation7 + $0xd8] sm:$0xff]   ;;  %v2333_v20 = vld [vmem:[#allocation7 + $0x50] sm:$0xff]   ;;  %v2779_v35 = vsub.s32 %v145_v29, %v2776_v30 }
  0x5b   :  { %v2327_v14 = vld [vmem:[#allocation7 + $0x20] sm:$0xff]   ;;  %v2331_v18 = vld [vmem:[#allocation7 + $0x18] sm:$0xff]   ;;  %v2334_v21 = vld [vmem:[#allocation7 + $0xd0] sm:$0xff]  }
  0x5c   :  { %2122 = vmatpush3.bf16.msra.mxu0 %v2319_v6  ;;  %v2328_v15 = vld [vmem:[#allocation7 + $0xa0] sm:$0xff]   ;;  %v2332_v19 = vld [vmem:[#allocation7 + $0x98] sm:$0xff]   ;;  %v2335_v25 = vld [vmem:[#allocation7 + $0x10] sm:$0xff]  }
  0x5d   :  { %2144 = vmatpush3.bf16.msra.mxu1 %v2320_v7  ;;  %2123 = vmatprep.subr.bf16.mxu0 %v2321_v8  ;;  %v2336_v26 = vld [vmem:[#allocation7 + $0x90] sm:$0xff]   ;;  %v2337_v27 = vld [vmem:[#allocation7 + $0x48] sm:$0xff]   ;;  %v2341_v33 = vld [vmem:[#allocation7 + $0x40] sm:$0xff]  }
  0x5e   :  { %2145 = vmatprep.subr.bf16.mxu1 %v2322_v9  ;;  %v2338_v28 = vld [vmem:[#allocation7 + $0xc8] sm:$0xff]   ;;  %v2342_v34 = vld [vmem:[#allocation7 + $0xc0] sm:$0xff]   ;;  %v2346_v41 = vld [vmem:[#allocation7 + $0x178] sm:$0xff]  }
  0x5f   :  { %v2339_v31 = vld [vmem:[#allocation7 + $0x8] sm:$0xff]   ;;  %v2343_v36 = vld [vmem:[#allocation7] sm:$0xff]   ;;  %v2347_v42 = vld [vmem:[#allocation7 + $0x1f8] sm:$0xff]  }
  0x60   :  { %2124 = vmatpush3.bf16.msra.mxu0 %v2323_v10  ;;  %v2340_v32 = vld [vmem:[#allocation7 + $0x88] sm:$0xff]   ;;  %v2344_v37 = vld [vmem:[#allocation7 + $0x80] sm:$0xff]   ;;  %v2348_v46 = vld [vmem:[#allocation7 + $0x138] sm:$0xff]  }
  0x61   :  { %2146 = vmatpush3.bf16.msra.mxu1 %v2324_v11  ;;  %2125 = vmatprep.subr.bf16.mxu0 %v2325_v12  ;;  %v138_v38 = vld [vmem:[#allocation2] sm:$0xff]  ;;  %v2349_v49 = vld [vmem:[#allocation7 + $0x1b8] sm:$0xff]   ;;  %v2358_v60 = vld [vmem:[#allocation7 + $0x160] sm:$0xff]  }
  0x62   :  { %2147 = vmatprep.subr.bf16.mxu1 %v2326_v13  ;;  %v149_v39 = vrot.slane %v138_v38, %v2779_v35  ;;  %v142_v40 = vcombine.high %v138_v38, %v138_v38  ;;  %v2350_v51 = vld [vmem:[#allocation7 + $0x170] sm:$0xff]   ;;  %v2354_v56 = vld [vmem:[#allocation7 + $0x168] sm:$0xff]   ;;  %v2359_v61 = vld [vmem:[#allocation7 + $0x1e0] sm:$0xff]  }
  0x63   :  { %v2351_v53 = vld [vmem:[#allocation7 + $0x1f0] sm:$0xff]   ;;  %v2355_v57 = vld [vmem:[#allocation7 + $0x1e8] sm:$0xff]   ;;  %v2360_v62 = vld [vmem:[#allocation7 + $0x120] sm:$0xff]  }
  0x64   :  { %2126 = vmatpush3.bf16.msra.mxu0 %v2327_v14  ;;  %v157_v43 = vcombine.high %v149_v39, %v149_v39  ;;  %v156_v44 = vrot.slane %v142_v40, %v2779_v35  ;;  %v184_v45 = vpack.c.bf16 %v149_v39, %v149_v39  ;;  %v2352_v54 = vld [vmem:[#allocation7 + $0x130] sm:$0xff]   ;;  %v2356_v58 = vld [vmem:[#allocation7 + $0x128] sm:$0xff]   ;;  %v2361_v63 = vld [vmem:[#allocation7 + $0x1a0] sm:$0xff]  }
  0x65   :  { %2148 = vmatpush3.bf16.msra.mxu1 %v2328_v15  ;;  %2127 = vmatprep.subr.bf16.mxu0 %v2329_v16  ;;  %v2353_v55 = vld [vmem:[#allocation7 + $0x1b0] sm:$0xff]   ;;  %v2357_v59 = vld [vmem:[#allocation7 + $0x1a8] sm:$0xff]   ;;  %v2362_v0 = vld [vmem:[#allocation7 + $0x158] sm:$0xff]  }
  0x66   :  { %2149 = vmatprep.subr.bf16.mxu1 %v2330_v17  ;;  %v185_v47 = vpack.c.bf16 %v157_v43, %v157_v43  ;;  %v158_v48 = vcombine.high %v156_v44, %v156_v44  ;;  %v186_v50 = vpack.c.bf16 %v156_v44, %v156_v44  ;;  %v2363_v1 = vld [vmem:[#allocation7 + $0x1d8] sm:$0xff]   ;;  %v2366_v4 = vld [vmem:[#allocation7 + $0x150] sm:$0xff]   ;;  %v2370_v8 = vld [vmem:[#allocation7 + $0x148] sm:$0xff]  }
  0x67   :  { %v2364_v2 = vld [vmem:[#allocation7 + $0x118] sm:$0xff]   ;;  %v2367_v5 = vld [vmem:[#allocation7 + $0x1d0] sm:$0xff]   ;;  %v2371_v9 = vld [vmem:[#allocation7 + $0x1c8] sm:$0xff]  }
  0x68   :  { %2128 = vmatpush3.bf16.msra.mxu0 %v2331_v18  ;;  %743 = vmatprep.mubr.bf16.mxu0 %v185_v47  ;;  %v187_v52 = vpack.c.bf16 %v158_v48, %v158_v48  ;;  %v2365_v3 = vld [vmem:[#allocation7 + $0x198] sm:$0xff]   ;;  %v2368_v6 = vld [vmem:[#allocation7 + $0x110] sm:$0xff]   ;;  %v2372_v10 = vld [vmem:[#allocation7 + $0x108] sm:$0xff]  }
  0x69   :  { %2150 = vmatpush3.bf16.msra.mxu1 %v2332_v19  ;;  %2129 = vmatprep.subr.bf16.mxu0 %v2333_v20  ;;  %v2369_v7 = vld [vmem:[#allocation7 + $0x190] sm:$0xff]   ;;  %v2373_v11 = vld [vmem:[#allocation7 + $0x188] sm:$0xff]   ;;  %v2374_v12 = vld [vmem:[#allocation7 + $0x140] sm:$0xff]  }
  0x6a   :  { %2151 = vmatprep.subr.bf16.mxu1 %v2334_v21  ;;  %783 = vmatprep.mubr.bf16.mxu1 %v187_v52  ;;  %v2375_v13 = vld [vmem:[#allocation7 + $0x1c0] sm:$0xff]   ;;  %v139_v15 = vld [vmem:[#allocation2 + $0x8] sm:$0xff]  ;;  %v2391_v40 = vld [vmem:[#allocation8 + $0x8] sm:$0xff]  }
  0x6b   :  { %v2376_v14 = vld [vmem:[#allocation7 + $0x100] sm:$0xff]   ;;  %v166_v17 = vrot.slane %v139_v15, %v2779_v35  ;;  %v159_v18 = vcombine.high %v139_v15, %v139_v15  ;;  %v2381_v29 = vld [vmem:[#allocation8 + $0x30] sm:$0xff]  }
  0x6c   :  { %2130 = vmatpush3.bf16.msra.mxu0 %v2335_v25  ;;  %v2377_v16 = vld [vmem:[#allocation7 + $0x180] sm:$0xff]   ;;  %v2389_v38 = vld [vmem:[#allocation8 + $0x10] sm:$0xff]  }
  0x6d   :  { %2152 = vmatpush3.bf16.msra.mxu1 %v2336_v26  ;;  %2131 = vmatprep.subr.bf16.mxu0 %v2337_v27  ;;  %v174_v19 = vcombine.high %v166_v17, %v166_v17  ;;  %v173_v20 = vrot.slane %v159_v18, %v2779_v35  ;;  %v188_v21 = vpack.c.bf16 %v166_v17, %v166_v17  ;;  %v2379_v26 = vld [vmem:[#allocation8 + $0x38] sm:$0xff]   ;;  %v2386_v35 = vld [vmem:[#allocation10 + $0x20] sm:$0xff]   ;;  %v2390_v39 = vld [vmem:[#allocation10 + $0x10] sm:$0xff]  }
  0x6e   :  { %2153 = vmatprep.subr.bf16.mxu1 %v2338_v28  ;;  %v2380_v27 = vld [vmem:[#allocation10 + $0x38] sm:$0xff]   ;;  %v2661_v28 = vmov 0.0   ;;  %v2394_v43 = vld [vmem:[#allocation10] sm:$0xff]   ;;  %v2818_v17 = vld [vmem:[#allocation13 + $0x1c8] sm:$0xff] }
  0x6f   :  { %v189_v22 = vpack.c.bf16 %v174_v19, %v174_v19  ;;  %v175_v23 = vcombine.high %v173_v20, %v173_v20  ;;  %v190_v24 = vpack.c.bf16 %v173_v20, %v173_v20  ;;  %v1271_v15 = vld [vmem:[#allocation13 + $0x1c0] sm:$0xff]  ;;  %v2820_v20 = vld [vmem:[#allocation13 + $0x1e8] sm:$0xff] }
  0x70   :  { %2132 = vmatpush3.bf16.msra.mxu0 %v2339_v31  ;;  %v2382_v31 = vld [vmem:[#allocation10 + $0x30] sm:$0xff]  }
  0x71   :  { %2154 = vmatpush3.bf16.msra.mxu1 %v2340_v32  ;;  %2133 = vmatprep.subr.bf16.mxu0 %v2341_v33  ;;  %v191_v25 = vpack.c.bf16 %v175_v23, %v175_v23  ;;  %v2383_v32 = vld [vmem:[#allocation8 + $0x28] sm:$0xff]   ;;  %v2109_v23 = vcombine.low %v2818_v17, %v2820_v20 }
  0x72   :  { %2155 = vmatprep.subr.bf16.mxu1 %v2342_v34  ;;  %v2384_v33 = vld [vmem:[#allocation10 + $0x28] sm:$0xff]   ;;  %v2385_v34 = vld [vmem:[#allocation8 + $0x20] sm:$0xff]  }
  0x74   :  { %2134 = vmatpush3.bf16.msra.mxu0 %v2343_v36  ;;  %v2387_v36 = vld [vmem:[#allocation8 + $0x18] sm:$0xff]  }
  0x75   :  { %2156 = vmatpush3.bf16.msra.mxu1 %v2344_v37  ;;  %2163 = vmatprep.subr.bf16.mxu0 %v2346_v41  ;;  %v2388_v37 = vld [vmem:[#allocation10 + $0x18] sm:$0xff]   ;;  %v2392_v41 = vld [vmem:[#allocation10 + $0x8] sm:$0xff]  }
  0x76   :  { %2185 = vmatprep.subr.bf16.mxu1 %v2347_v42  ;;  %v2393_v42 = vld [vmem:[#allocation8] sm:$0xff]  }
  0x77   :  { %744 = vmatmul.mubr.bf16.vlgmr.msra.gmra.mxu0 %v184_v45 }
  0x78   :  { %2164 = vmatpush3.bf16.msra.mxu0 %v2348_v46  ;;  %784 = vmatmul.mubr.bf16.vlgmr.msra.gmra.mxu1 %v186_v50 }
  0x79   :  { %2165 = vmatprep.subr.bf16.mxu0 %v2350_v51  ;;  %2186 = vmatpush3.bf16.msra.mxu1 %v2349_v49 }
  0x7a   :  { %2187 = vmatprep.subr.bf16.mxu1 %v2351_v53  ;;  %823 = vmatprep.mubr.bf16.mxu0 %v189_v22  ;;  %v1959_v53 = vld [vmem:[%s2868_s3] ss:$0 sm:$0xff]  ;;  %v1267_v22 = vld [vmem:[#allocation13 + $0x1a0] sm:$0xff] }
  0x7b   :  { %863 = vmatprep.mubr.bf16.mxu1 %v191_v25 }
  0x7c   :  { %2166 = vmatpush3.bf16.msra.mxu0 %v2352_v54 }
  0x7d   :  { %2167 = vmatprep.subr.bf16.mxu0 %v2354_v56  ;;  %2188 = vmatpush3.bf16.msra.mxu1 %v2353_v55 }
  0x7e   :  { %2189 = vmatprep.subr.bf16.mxu1 %v2355_v57 }
  0x80   :  { %2168 = vmatpush3.bf16.msra.mxu0 %v2356_v58 }
  0x81   :  { %2169 = vmatprep.subr.bf16.mxu0 %v2358_v60  ;;  %2190 = vmatpush3.bf16.msra.mxu1 %v2357_v59 }
  0x82   :  { %2191 = vmatprep.subr.bf16.mxu1 %v2359_v61 }
  0x84   :  { %2170 = vmatpush3.bf16.msra.mxu0 %v2360_v62 }
  0x85   :  { %2171 = vmatprep.subr.bf16.mxu0 %v2362_v0  ;;  %2192 = vmatpush3.bf16.msra.mxu1 %v2361_v63 }
  0x86   :  { %2193 = vmatprep.subr.bf16.mxu1 %v2363_v1 }
  0x88   :  { %2172 = vmatpush3.bf16.msra.mxu0 %v2364_v2 }
  0x89   :  { %2173 = vmatprep.subr.bf16.mxu0 %v2366_v4  ;;  %2194 = vmatpush3.bf16.msra.mxu1 %v2365_v3 }
  0x8a   :  { %2195 = vmatprep.subr.bf16.mxu1 %v2367_v5 }
  0x8c   :  { %2174 = vmatpush3.bf16.msra.mxu0 %v2368_v6  ;;  %v2395_v6 = vld [vmem:[#allocation11 + $0x38] sm:$0xff]  }
  0x8d   :  { %2175 = vmatprep.subr.bf16.mxu0 %v2370_v8  ;;  %2196 = vmatpush3.bf16.msra.mxu1 %v2369_v7  ;;  %v2396_v8 = vld [vmem:[#allocation11 + $0x30] sm:$0xff]  }
  0x8e   :  { %2197 = vmatprep.subr.bf16.mxu1 %v2371_v9  ;;  %v2397_v9 = vld [vmem:[#allocation11 + $0x28] sm:$0xff]  }
  0x90   :  { %2176 = vmatpush3.bf16.msra.mxu0 %v2372_v10  ;;  %v2398_v10 = vld [vmem:[#allocation11 + $0x20] sm:$0xff]  }
  0x91   :  { %2177 = vmatprep.subr.bf16.mxu0 %v2374_v12  ;;  %2198 = vmatpush3.bf16.msra.mxu1 %v2373_v11  ;;  %v2399_v11 = vld [vmem:[#allocation11 + $0x18] sm:$0xff]   ;;  %v2400_v12 = vld [vmem:[#allocation11 + $0x10] sm:$0xff]  }
  0x92   :  { %2199 = vmatprep.subr.bf16.mxu1 %v2375_v13  ;;  %v2401_v13 = vld [vmem:[#allocation11 + $0x8] sm:$0xff]  }
  0x94   :  { %2178 = vmatpush3.bf16.msra.mxu0 %v2376_v14  ;;  %v2402_v14 = vld [vmem:[#allocation11] sm:$0xff]  }
  0x95   :  { %2200 = vmatpush3.bf16.msra.mxu1 %v2377_v16  ;;  %2234 = vmatprep.subr.bf16.mxu0 %v2661_v28  ;;  %v1275_v16 = vld [vmem:[#allocation13 + $0x1e0] sm:$0xff] }
  0x96   :  { %2254 = vmatprep.subr.bf16.mxu1 %v2661_v28  ;;  %v2107_v18 = vcombine.low %v1271_v15, %v1275_v16  ;;  %v2108_v19 = vcombine.high %v1271_v15, %v1275_v16  ;;  %v1244_v15 = vld [vmem:[#allocation13 + $0xe8] sm:$0xff] }
  0x97   :  { %824 = vmatmul.mubr.bf16.vlgmr.msra.gmra.mxu0 %v188_v21  ;;  %v1263_v21 = vld [vmem:[#allocation13 + $0x180] sm:$0xff] }
  0x98   :  { %864 = vmatmul.mubr.bf16.vlgmr.msra.gmra.mxu1 %v190_v24  ;;  %2235 = vmatpush3.bf16.msra.mxu0 %v2379_v26  ;;  %v2110_v24 = vcombine.high %v2818_v17, %v2820_v20  ;;  %v2100_v25 = vcombine.high %v1263_v21, %v1267_v22  ;;  %v2099_v26 = vcombine.low %v1263_v21, %v1267_v22  ;;  %v1236_v21 = vld [vmem:[#allocation13 + $0xa8] sm:$0xff] }
  0x99   :  { %2255 = vmatpush3.bf16.msra.mxu1 %v2380_v27  ;;  %2236 = vmatprep.subr.bf16.mxu0 %v2661_v28  ;;  %v1255_v27 = vld [vmem:[#allocation13 + $0x140] sm:$0xff]  ;;  %v1224_v22 = vld [vmem:[#allocation13 + $0x48] sm:$0xff] }
  0x9a   :  { %2256 = vmatprep.subr.bf16.mxu1 %v2661_v28  ;;  %2250 = vmatprep.mubr.msk.bf16.mxu0 %vm2662_vm0, %v2661_v28 }
  0x9b   :  { %2270 = vmatprep.mubr.msk.bf16.mxu1 %vm2662_vm0, %v2661_v28 }
  0x9c   :  { %2237 = vmatpush3.bf16.msra.mxu0 %v2381_v29 }
  0x9d   :  { %2257 = vmatpush3.bf16.msra.mxu1 %v2382_v31  ;;  %2238 = vmatprep.subr.bf16.mxu0 %v2661_v28 }
  0x9e   :  { %2258 = vmatprep.subr.bf16.mxu1 %v2661_v28 }
  0xa0   :  { %2239 = vmatpush3.bf16.msra.mxu0 %v2383_v32  ;;  %v1247_v32 = vld [vmem:[#allocation13 + $0x100] sm:$0xff] }
  0xa1   :  { %2259 = vmatpush3.bf16.msra.mxu1 %v2384_v33  ;;  %2240 = vmatprep.subr.bf16.mxu0 %v2661_v28  ;;  %v1251_v33 = vld [vmem:[#allocation13 + $0x120] sm:$0xff] }
  0xa2   :  { %2260 = vmatprep.subr.bf16.mxu1 %v2661_v28 }
  0xa4   :  { %2241 = vmatpush3.bf16.msra.mxu0 %v2385_v34  ;;  %v2084_v34 = vcombine.high %v1247_v32, %v1251_v33 }
  0xa5   :  { %2261 = vmatpush3.bf16.msra.mxu1 %v2386_v35  ;;  %2242 = vmatprep.subr.bf16.mxu0 %v2661_v28  ;;  %v2083_v35 = vcombine.low %v1247_v32, %v1251_v33  ;;  %v1220_v32 = vld [vmem:[#allocation13 + $0x28] sm:$0xff] }
  0xa6   :  { %2262 = vmatprep.subr.bf16.mxu1 %v2661_v28 }
  0xa8   :  { %2243 = vmatpush3.bf16.msra.mxu0 %v2387_v36  ;;  %v1239_v36 = vld [vmem:[#allocation13 + $0xc0] sm:$0xff] }
  0xa9   :  { %2263 = vmatpush3.bf16.msra.mxu1 %v2388_v37  ;;  %2244 = vmatprep.subr.bf16.mxu0 %v2661_v28  ;;  %v1243_v37 = vld [vmem:[#allocation13 + $0xe0] sm:$0xff] }
  0xaa   :  { %2264 = vmatprep.subr.bf16.mxu1 %v2661_v28 }
  0xac   :  { %2245 = vmatpush3.bf16.msra.mxu0 %v2389_v38  ;;  %v2076_v38 = vcombine.high %v1239_v36, %v1243_v37 }
  0xad   :  { %2265 = vmatpush3.bf16.msra.mxu1 %v2390_v39  ;;  %2246 = vmatprep.subr.bf16.mxu0 %v2661_v28  ;;  %v2075_v39 = vcombine.low %v1239_v36, %v1243_v37  ;;  %v1273_v36 = vld [vmem:[#allocation13 + $0x1d0] sm:$0xff] }
  0xae   :  { %2266 = vmatprep.subr.bf16.mxu1 %v2661_v28  ;;  %v1277_v37 = vld [vmem:[#allocation13 + $0x1f0] sm:$0xff] }
  0xb0   :  { %2247 = vmatpush3.bf16.msra.mxu0 %v2391_v40  ;;  %v1231_v40 = vld [vmem:[#allocation13 + $0x80] sm:$0xff] }
  0xb1   :  { %2267 = vmatpush3.bf16.msra.mxu1 %v2392_v41  ;;  %2248 = vmatprep.subr.bf16.mxu0 %v2661_v28  ;;  %v1235_v41 = vld [vmem:[#allocation13 + $0xa0] sm:$0xff] }
  0xb2   :  { %2268 = vmatprep.subr.bf16.mxu1 %v2661_v28 }
  0xb4   :  { %2249 = vmatpush3.bf16.msra.mxu0 %v2393_v42  ;;  %v2068_v42 = vcombine.high %v1231_v40, %v1235_v41 }
  0xb5   :  { %2269 = vmatpush3.bf16.msra.mxu1 %v2394_v43  ;;  %2274 = vmatprep.subr.bf16.mxu0 %v2661_v28  ;;  %v2067_v43 = vcombine.low %v1231_v40, %v1235_v41  ;;  %v2112_v40 = vcombine.high %v1273_v36, %v1277_v37  ;;  %v1278_v41 = vld [vmem:[#allocation13 + $0x1f8] sm:$0xff] }
  0xb6   :  { %1641 = vmatprep.subr.bf16.mxu1 %v2108_v19  ;;  %v1232_v19 = vld [vmem:[#allocation13 + $0x88] sm:$0xff] }
  0xb7   :  { %v2070_v20 = vcombine.high %v1232_v19, %v1236_v21 }
 0x137   :  { %v2135_v44 = vpop.f32.mrf.mxu0 }
 0x138   :  { %v2157_v45 = vpop.f32.mrf.mxu1 }
 0x139   :  { %v2136_v46 = vpop.f32.mrf.mxu0 }
 0x13a   :  { %v2158_v47 = vpop.f32.mrf.mxu1  ;;  %v2137_v52 = vadd.f32 %v2136_v46, %v2135_v44  ;;  %v1223_v44 = vld [vmem:[#allocation13 + $0x40] sm:$0xff] }
 0x13b   :  { %v2138_v48 = vpop.f32.mrf.mxu0  ;;  %v2159_v55 = vadd.f32 %v2158_v47, %v2157_v45  ;;  %v1227_v45 = vld [vmem:[#allocation13 + $0x60] sm:$0xff] }
 0x13c   :  { %v2160_v49 = vpop.f32.mrf.mxu1  ;;  %v746_v54 = vadd.f32 %v2137_v52, %v1959_v53  ;;  %v2060_v46 = vcombine.high %v1223_v44, %v1227_v45  ;;  %v2059_v47 = vcombine.low %v1223_v44, %v1227_v45  ;;  %v2024_v48 = vld [vmem:[%s2870_s5] ss:$0 sm:$0xff] }
 0x13d   :  { %v2139_v50 = vpop.f32.mrf.mxu0  ;;  %v2033_v49 = vld [vmem:[%s2872_s7] ss:$0 sm:$0xff] }
 0x13e   :  { %v2161_v51 = vpop.f32.mrf.mxu1  ;;  %v786_v59 = vadd.f32 %v2159_v55, %v746_v54  ;;  %v2042_v45 = vld [vmem:[%s2874_s9] ss:$0 sm:$0xff]  ;;  %s2664_s9 = smov [#allocation15]  }
 0x13f   :  { %s1930_s16 = sshll.u32 %s2664_s9, 4  ;;  %s1931_s16 = int_to_ptr.vmem [resolvable:$true] %s1930_s16 }
 0x140   :  { %s2577_s17 = scalar_lea.vmem %s1931_s16, 32  ;;  %p2582_p8 = scmp.lt.s32.totalorder %s1931_s16, %s1931_s16 }
 0x141   :  { %p2578_p7 = scmp.ne.s32.totalorder %s1931_s16, %s2577_s17  ;;  %p2583_p9 = scmp.lt.s32.totalorder %s2577_s17, %s2577_s17 }
 0x143   :  { %p2584_p10 = por %p2583_p9, %p2582_p8 }
 0x145   :  { %p2585_p11 = pnand %p2584_p10, %p2578_p7 }
 0x157   :  { %v2179_v56 = vpop.f32.mrf.mxu0 }
 0x158   :  { %v2201_v57 = vpop.f32.mrf.mxu1 }
 0x159   :  { %v2180_v58 = vpop.f32.mrf.mxu0 }
 0x15a   :  { %v2181_v60 = vadd.f32 %v2180_v58, %v2179_v56  ;;  %v2202_v61 = vpop.f32.mrf.mxu1 }
 0x15b   :  { %v2182_v62 = vpop.f32.mrf.mxu0  ;;  %v2203_v0 = vadd.f32 %v2202_v61, %v2201_v57 }
 0x15c   :  { %v826_v63 = vadd.f32 %v2181_v60, %v786_v59  ;;  %v2204_v1 = vpop.f32.mrf.mxu1  ;;  %v1095_v62 = vld [vmem:[#allocation5] sm:$0x3] }
 0x15d   :  { %v2183_v2 = vpop.f32.mrf.mxu0  ;;  %v1264_v1 = vld [vmem:[#allocation13 + $0x188] sm:$0xff] }
 0x15e   :  { %v866_v3 = vadd.f32 %v2203_v0, %v826_v63  ;;  %v2205_v4 = vpop.f32.mrf.mxu1  ;;  %v1268_v2 = vld [vmem:[#allocation13 + $0x1a8] sm:$0xff] }
 0x160   :  { %v871_v5 = vmax.f32 %v866_v3, 0.0 }
 0x162   :  { %v872_v7 = vpack.c.bf16 %v871_v5, %v871_v5  ;;  %v2102_v5 = vcombine.high %v1264_v1, %v1268_v2 }
 0x164   :  { %2251 = vmatmul.mubr.bf16.vlgmr.msra.gmra.mxu0 %v872_v7  ;;  %2271 = vmatmul.mubr.bf16.vlgmr.msra.gmra.mxu1 %v872_v7  ;;  %v1260_v7 = vld [vmem:[#allocation13 + $0x168] sm:$0xff] }
 0x165   :  { %2275 = vmatpush3.bf16.msra.mxu0 %v2395_v6  ;;  %2290 = vmatprep.mubr.msk.bf16.mxu0 %vm2662_vm0, %v2661_v28  ;;  %v1256_v6 = vld [vmem:[#allocation13 + $0x148] sm:$0xff] }
 0x166   :  { %2276 = vmatprep.subr.bf16.mxu0 %v2661_v28  ;;  %1642 = vmatpush1.bf16.msra.mxu1 %v2107_v18 }
 0x167   :  { %1643 = vmatprep.subr.bf16.mxu1 %v2100_v25 }
 0x169   :  { %2277 = vmatpush3.bf16.msra.mxu0 %v2396_v8  ;;  %v2101_v8 = vcombine.low %v1264_v1, %v1268_v2 }
 0x16a   :  { %2278 = vmatprep.subr.bf16.mxu0 %v2661_v28  ;;  %1644 = vmatpush1.bf16.msra.mxu1 %v2099_v26 }
 0x16d   :  { %2279 = vmatpush3.bf16.msra.mxu0 %v2397_v9  ;;  %v2094_v9 = vcombine.high %v1256_v6, %v1260_v7 }
 0x16e   :  { %2280 = vmatprep.subr.bf16.mxu0 %v2661_v28 }
 0x171   :  { %2281 = vmatpush3.bf16.msra.mxu0 %v2398_v10  ;;  %v1248_v10 = vld [vmem:[#allocation13 + $0x108] sm:$0xff] }
 0x172   :  { %2282 = vmatprep.subr.bf16.mxu0 %v2661_v28 }
 0x175   :  { %2283 = vmatpush3.bf16.msra.mxu0 %v2399_v11  ;;  %v1252_v11 = vld [vmem:[#allocation13 + $0x128] sm:$0xff] }
 0x176   :  { %2284 = vmatprep.subr.bf16.mxu0 %v2661_v28  ;;  %v2085_v16 = vcombine.low %v1248_v10, %v1252_v11 }
 0x179   :  { %2285 = vmatpush3.bf16.msra.mxu0 %v2400_v12  ;;  %v2093_v12 = vcombine.low %v1256_v6, %v1260_v7  ;;  %v1254_v6 = vld [vmem:[#allocation13 + $0x138] sm:$0xff] }
 0x17a   :  { %2286 = vmatprep.subr.bf16.mxu0 %v2661_v28 }
 0x17d   :  { %2287 = vmatpush3.bf16.msra.mxu0 %v2401_v13  ;;  %v2086_v13 = vcombine.high %v1248_v10, %v1252_v11  ;;  %v1241_v11 = vld [vmem:[#allocation13 + $0xd0] sm:$0xff] }
 0x17e   :  { %2288 = vmatprep.subr.bf16.mxu0 %v2661_v28  ;;  %v1259_v28 = vld [vmem:[#allocation13 + $0x160] sm:$0xff] }
 0x17f   :  { %v2092_v29 = vcombine.high %v1255_v27, %v1259_v28  ;;  %v2091_v31 = vcombine.low %v1255_v27, %v1259_v28  ;;  %v1215_v27 = vld [vmem:[#allocation13] sm:$0xff] }
 0x180   :  { %v1219_v28 = vld [vmem:[#allocation13 + $0x20] sm:$0xff] }
 0x181   :  { %2289 = vmatpush3.bf16.msra.mxu0 %v2402_v14  ;;  %1645 = vmatprep.subr.bf16.mxu1 %v2092_v29  ;;  %v1240_v14 = vld [vmem:[#allocation13 + $0xc8] sm:$0xff]  ;;  %v2051_v33 = vcombine.low %v1215_v27, %v1219_v28 }
 0x182   :  { %1682 = vmatprep.subr.bf16.mxu0 %v2110_v24  ;;  %1646 = vmatpush1.bf16.msra.mxu1 %v2091_v31  ;;  %v2078_v18 = vcombine.high %v1240_v14, %v1244_v15  ;;  %v2077_v17 = vcombine.low %v1240_v14, %v1244_v15  ;;  %v2069_v24 = vcombine.low %v1232_v19, %v1236_v21  ;;  %v1216_v29 = vld [vmem:[#allocation13 + $0x8] sm:$0xff]  ;;  %v1246_v14 = vld [vmem:[#allocation13 + $0xf8] sm:$0xff]  ;;  %v1233_v21 = vld [vmem:[#allocation13 + $0x90] sm:$0xff] }
 0x183   :  { %1647 = vmatprep.subr.bf16.mxu1 %v2084_v34  ;;  %v2052_v31 = vcombine.high %v1215_v27, %v1219_v28  ;;  %v2053_v34 = vcombine.low %v1216_v29, %v1220_v32  ;;  %v1225_v27 = vld [vmem:[#allocation13 + $0x50] sm:$0xff] }
 0x184   :  { %v1229_v28 = vld [vmem:[#allocation13 + $0x70] sm:$0xff] }
 0x186   :  { %1648 = vmatpush1.bf16.msra.mxu1 %v2083_v35  ;;  %v2054_v35 = vcombine.high %v1216_v29, %v1220_v32  ;;  %v1226_v29 = vld [vmem:[#allocation13 + $0x58] sm:$0xff] }
 0x187   :  { %1649 = vmatprep.subr.bf16.mxu1 %v2076_v38  ;;  %v1274_v38 = vld [vmem:[#allocation13 + $0x1d8] sm:$0xff] }
 0x188   :  { %v2114_v44 = vcombine.high %v1274_v38, %v1278_v41 }
 0x18a   :  { %1650 = vmatpush1.bf16.msra.mxu1 %v2075_v39  ;;  %v2111_v39 = vcombine.low %v1273_v36, %v1277_v37  ;;  %v1217_v36 = vld [vmem:[#allocation13 + $0x10] sm:$0xff] }
 0x18b   :  { %1651 = vmatprep.subr.bf16.mxu1 %v2068_v42  ;;  %v2663_v42 = vmov 0   ;;  %v1221_v37 = vld [vmem:[#allocation13 + $0x30] sm:$0xff] }
 0x18c   :  { %1673 = vmatprep.mubr.bf16.mxu1 %v2663_v42 }
 0x18e   :  { %1652 = vmatpush1.bf16.msra.mxu1 %v2067_v43  ;;  %v2113_v43 = vcombine.low %v1274_v38, %v1278_v41  ;;  %v1218_v38 = vld [vmem:[#allocation13 + $0x18] sm:$0xff] }
 0x18f   :  { %1653 = vmatprep.subr.bf16.mxu1 %v2060_v46 }
 0x192   :  { %1654 = vmatpush1.bf16.msra.mxu1 %v2059_v47 }
 0x193   :  { %1655 = vmatprep.subr.bf16.mxu1 %v2052_v31  ;;  %v1230_v31 = vld [vmem:[#allocation13 + $0x78] sm:$0xff] }
 0x194   :  { %v2065_v41 = vcombine.low %v1226_v29, %v1230_v31 }
 0x196   :  { %1656 = vmatpush1.bf16.msra.mxu1 %v2051_v33 }
 0x197   :  { %1723 = vmatprep.subr.bf16.mxu1 %v2112_v40  ;;  %v2063_v40 = vcombine.low %v1225_v27, %v1229_v28 }
 0x224   :  { %v978_v50 = vpop.f32.mrf.mxu0  ;;  %v1089_v51 = vpop.f32.mrf.mxu1 }
 0x225   :  { %v979_v52 = vadd.f32 %v2024_v48, %v978_v50  ;;  %v1090_v53 = vadd.f32 %v2033_v49, %v1089_v51  ;;  %v1265_v48 = vld [vmem:[#allocation13 + $0x190] sm:$0xff]  ;;  %v1266_v51 = vld [vmem:[#allocation13 + $0x198] sm:$0xff] }
 0x226   :  { %v2252_v54 = vpop.f32.mrf.mxu0  ;;  %v2272_v55 = vpop.f32.mrf.mxu1  ;;  %v1269_v50 = vld [vmem:[#allocation13 + $0x1b0] sm:$0xff] }
 0x227   :  { %1912 = vst [vmem:[#allocation15] sm:$0x3] %v979_v52  ;;  %v1096_v56 = vmul.f32 0.5, %v1090_v53  ;;  %1913 = vst [vmem:[#allocation17] sm:$0x3] %v1090_v53 }
 0x228   :  { %v981_v57 = vpop.f32.mrf.mxu0  ;;  %v1092_v58 = vpop.f32.mrf.mxu1 }
 0x229   :  { %v1097_v59 = vmul.f32 1.442695, %v1096_v56  ;;  %v2104_v56 = vcombine.high %v1265_v48, %v1269_v50  ;;  %v1257_v58 = vld [vmem:[#allocation13 + $0x150] sm:$0xff] }
 0x22a   :  { %v2253_v60 = vpop.f32.mrf.mxu0  ;;  %v2273_v61 = vpop.f32.mrf.mxu1 }
 0x22b   :  { %2403 = vpow2.f32 %v1097_v59  ;;  %v1261_v60 = vld [vmem:[#allocation13 + $0x170] sm:$0xff]  ;;  %v1258_v61 = vld [vmem:[#allocation13 + $0x158] sm:$0xff] }
 0x22c   :  { %v2096_v1 = vcombine.high %v1257_v58, %v1261_v60  ;;  %v2095_v7 = vcombine.low %v1257_v58, %v1261_v60 }
 0x238   :  { %v2404_v63 = vpop.eup %2403 }
 0x239   :  { %v1099_v0 = vmul.f32 %v2404_v63, %v1095_v62  ;;  %v1262_v62 = vld [vmem:[#allocation13 + $0x178] sm:$0xff]  ;;  %v2103_v63 = vcombine.low %v1265_v48, %v1269_v50 }
 0x23a   :  { %v2098_v2 = vcombine.high %v1258_v61, %v1262_v62 }
 0x23b   :  { %v1100_v3 = vadd.f32 %v1099_v0, %v979_v52  ;;  %v1270_v52 = vld [vmem:[#allocation13 + $0x1b8] sm:$0xff] }
 0x23c   :  { %v2106_v57 = vcombine.high %v1266_v51, %v1270_v52  ;;  %v2105_v0 = vcombine.low %v1266_v51, %v1270_v52 }
 0x23d   :  { %v1101_v4 = vpack.c.bf16 %v1100_v3, %v1100_v3  ;;  %v1249_v3 = vld [vmem:[#allocation13 + $0x110] sm:$0xff] }
 0x23f   :  { %2291 = vmatmul.mubr.bf16.vlgmr.msra.gmra.mxu0 %v1101_v4  ;;  %v1253_v4 = vld [vmem:[#allocation13 + $0x130] sm:$0xff] }
 0x240   :  { %1683 = vmatpush1.bf16.msra.mxu0 %v2109_v23  ;;  %v1228_v23 = vld [vmem:[#allocation13 + $0x68] sm:$0xff]  ;;  %1714 = vmatprep.mubr.bf16.mxu0 %v2663_v42  ;;  %v2087_v15 = vcombine.low %v1249_v3, %v1253_v4 }
 0x241   :  { %1684 = vmatprep.subr.bf16.mxu0 %v2102_v5  ;;  %v2062_v25 = vcombine.high %v1224_v22, %v1228_v23  ;;  %v2061_v26 = vcombine.low %v1224_v22, %v1228_v23  ;;  %v1250_v5 = vld [vmem:[#allocation13 + $0x118] sm:$0xff] }
 0x242   :  { %v2090_v10 = vcombine.high %v1250_v5, %v1254_v6  ;;  %v1238_v22 = vld [vmem:[#allocation13 + $0xb8] sm:$0xff] }
 0x244   :  { %1685 = vmatpush1.bf16.msra.mxu0 %v2101_v8  ;;  %v2097_v8 = vcombine.low %v1258_v61, %v1262_v62 }
 0x245   :  { %1686 = vmatprep.subr.bf16.mxu0 %v2094_v9  ;;  %v2088_v9 = vcombine.high %v1249_v3, %v1253_v4 }
 0x248   :  { %1687 = vmatpush1.bf16.msra.mxu0 %v2093_v12  ;;  %v1245_v12 = vld [vmem:[#allocation13 + $0xf0] sm:$0xff] }
 0x249   :  { %1688 = vmatprep.subr.bf16.mxu0 %v2086_v13  ;;  %v1242_v13 = vld [vmem:[#allocation13 + $0xd8] sm:$0xff]  ;;  %v2079_v23 = vcombine.low %v1241_v11, %v1245_v12 }
 0x24a   :  { %v2082_v19 = vcombine.high %v1242_v13, %v1246_v14 }
 0x24c   :  { %1689 = vmatpush1.bf16.msra.mxu0 %v2085_v16  ;;  %v2089_v16 = vcombine.low %v1250_v5, %v1254_v6 }
 0x24d   :  { %1690 = vmatprep.subr.bf16.mxu0 %v2078_v18  ;;  %v2080_v18 = vcombine.high %v1241_v11, %v1245_v12 }
 0x250   :  { %1691 = vmatpush1.bf16.msra.mxu0 %v2077_v17  ;;  %v1237_v17 = vld [vmem:[#allocation13 + $0xb0] sm:$0xff] }
 0x251   :  { %1692 = vmatprep.subr.bf16.mxu0 %v2070_v20  ;;  %v1234_v20 = vld [vmem:[#allocation13 + $0x98] sm:$0xff]  ;;  %v2071_v32 = vcombine.low %v1233_v21, %v1237_v17 }
 0x252   :  { %v2073_v33 = vcombine.low %v1234_v20, %v1238_v22 }
 0x254   :  { %1693 = vmatpush1.bf16.msra.mxu0 %v2069_v24  ;;  %v2081_v24 = vcombine.low %v1242_v13, %v1246_v14 }
 0x255   :  { %1694 = vmatprep.subr.bf16.mxu0 %v2062_v25  ;;  %v2072_v25 = vcombine.high %v1233_v21, %v1237_v17 }
 0x258   :  { %1695 = vmatpush1.bf16.msra.mxu0 %v2061_v26  ;;  %v2074_v26 = vcombine.high %v1234_v20, %v1238_v22 }
 0x259   :  { %1696 = vmatprep.subr.bf16.mxu0 %v2054_v35  ;;  %v2066_v35 = vcombine.high %v1226_v29, %v1230_v31 }
 0x25c   :  { %1697 = vmatpush1.bf16.msra.mxu0 %v2053_v34  ;;  %v2064_v34 = vcombine.high %v1225_v27, %v1229_v28 }
 0x25d   :  { %1764 = vmatprep.subr.bf16.mxu0 %v2114_v44  ;;  %v2055_v44 = vcombine.low %v1217_v36, %v1221_v37 }
 0x2ff   :  { %v1207_v46 = vpop.f32.mrf.mxu0 }
 0x300   :  { %v1208_v47 = vadd.f32 %v2042_v45, %v1207_v46 }
 0x301   :  { %v2292_v49 = vpop.f32.mrf.mxu0 }
 0x302   :  { %v1213_v53 = vmax.f32 %v1208_v47, 0.0 }
 0x303   :  { %v1210_v54 = vpop.f32.mrf.mxu0 }
 0x304   :  { %v2838_v55 = vpack.c.bf16 %v1213_v53, %v1213_v53 }
 0x305   :  { %v2293_v59 = vpop.f32.mrf.mxu0 }
 0x306   :  { %1674 = vmatmul.mubr.bf16.vlgmr.msra.gmra.mxu1 %v2838_v55  ;;  %1715 = vmatmul.mubr.bf16.vlgmr.msra.gmra.mxu0 %v2838_v55 }
 0x307   :  { %1724 = vmatpush1.bf16.msra.mxu1 %v2111_v39  ;;  %1765 = vmatpush1.bf16.msra.mxu0 %v2113_v43  ;;  %v1222_v39 = vld [vmem:[#allocation13 + $0x38] sm:$0xff] }
 0x308   :  { %1725 = vmatprep.subr.bf16.mxu1 %v2104_v56  ;;  %1766 = vmatprep.subr.bf16.mxu0 %v2106_v57  ;;  %v2058_v43 = vcombine.high %v1218_v38, %v1222_v39  ;;  %v2057_v45 = vcombine.low %v1218_v38, %v1222_v39 }
 0x309   :  { %1755 = vmatprep.mubr.bf16.mxu1 %v2663_v42  ;;  %1796 = vmatprep.mubr.bf16.mxu0 %v2663_v42  ;;  %v2056_v42 = vcombine.high %v1217_v36, %v1221_v37 }
 0x30b   :  { %1726 = vmatpush1.bf16.msra.mxu1 %v2103_v63  ;;  %1767 = vmatpush1.bf16.msra.mxu0 %v2105_v0 }
 0x30c   :  { %1727 = vmatprep.subr.bf16.mxu1 %v2096_v1  ;;  %1768 = vmatprep.subr.bf16.mxu0 %v2098_v2 }
 0x30f   :  { %1728 = vmatpush1.bf16.msra.mxu1 %v2095_v7  ;;  %1769 = vmatpush1.bf16.msra.mxu0 %v2097_v8 }
 0x310   :  { %1729 = vmatprep.subr.bf16.mxu1 %v2088_v9  ;;  %1770 = vmatprep.subr.bf16.mxu0 %v2090_v10 }
 0x313   :  { %1730 = vmatpush1.bf16.msra.mxu1 %v2087_v15  ;;  %1771 = vmatpush1.bf16.msra.mxu0 %v2089_v16 }
 0x314   :  { %1731 = vmatprep.subr.bf16.mxu1 %v2080_v18  ;;  %1772 = vmatprep.subr.bf16.mxu0 %v2082_v19 }
 0x317   :  { %1732 = vmatpush1.bf16.msra.mxu1 %v2079_v23  ;;  %1773 = vmatpush1.bf16.msra.mxu0 %v2081_v24 }
 0x318   :  { %1733 = vmatprep.subr.bf16.mxu1 %v2072_v25  ;;  %1774 = vmatprep.subr.bf16.mxu0 %v2074_v26 }
 0x31b   :  { %1734 = vmatpush1.bf16.msra.mxu1 %v2071_v32  ;;  %1775 = vmatpush1.bf16.msra.mxu0 %v2073_v33 }
 0x31c   :  { %1735 = vmatprep.subr.bf16.mxu1 %v2064_v34  ;;  %1776 = vmatprep.subr.bf16.mxu0 %v2066_v35 }
 0x31f   :  { %1736 = vmatpush1.bf16.msra.mxu1 %v2063_v40  ;;  %1777 = vmatpush1.bf16.msra.mxu0 %v2065_v41 }
 0x320   :  { %1737 = vmatprep.subr.bf16.mxu1 %v2056_v42  ;;  %1778 = vmatprep.subr.bf16.mxu0 %v2058_v43 }
 0x323   :  { %1738 = vmatpush1.bf16.msra.mxu1 %v2055_v44  ;;  %1779 = vmatpush1.bf16.msra.mxu0 %v2057_v45 }
 0x326   :  { %1756 = vmatmul.mubr.bf16.vlgmr.msra.gmra.mxu1 %v2838_v55  ;;  %1797 = vmatmul.mubr.bf16.vlgmr.msra.gmra.mxu0 %v2838_v55 }
 0x327   :  { %2588 = shalt.err (!%p2585_p11)
}
 0x328   :  { %1933 = dma.vmem_to_hbm [thread:$0]  %s1931_s16, 32, %s2878_s13, [#allocation16]  }
 0x329   :  { %s2665_s8 = smov [#allocation17]  }
 0x32a   :  { %s1940_s20 = sshll.u32 %s2665_s8, 4  ;;  %s1941_s20 = int_to_ptr.vmem [resolvable:$true] %s1940_s20 }
 0x32b   :  { %s2597_s21 = scalar_lea.vmem %s1941_s20, 32  ;;  %p2602_p13 = scmp.lt.s32.totalorder %s1941_s20, %s1941_s20 }
 0x32c   :  { %p2598_p12 = scmp.ne.s32.totalorder %s1941_s20, %s2597_s21  ;;  %p2603_p0 = scmp.lt.s32.totalorder %s2597_s21, %s2597_s21 }
 0x32e   :  { %p2604_p1 = por %p2603_p0, %p2602_p13 }
 0x330   :  { %p2605_p2 = pnand %p2604_p1, %p2598_p12 }
 0x332   :  { %2608 = shalt.err (!%p2605_p2)
}
 0x333   :  { %1943 = dma.vmem_to_hbm [thread:$0]  %s1941_s20, 32, %s2879_s14, [#allocation16]   ;;  %v1287_v54 = vsub.s32 1, %v2776_v30  ;;  %v1295_v55 = vsub.s32 3, %v2776_v30  ;;  %v1283_v56 = vsub.s32 0, %v2776_v30  ;;  %v1279_v57 = vld [vmem:[%s2876_s11] sm:$0xff] }
 0x334   :  { %v1291_v58 = vsub.s32 2, %v2776_v30  ;;  %v1299_v8 = vsub.s32 4, %v2776_v30  ;;  %v1307_v9 = vsub.s32 6, %v2776_v30  ;;  %v1303_v12 = vsub.s32 5, %v2776_v30  ;;  %s2667_s11 = smov [#allocation14]  }
 0x335   :  { %v1288_v59 = vrot.slane %v1279_v57, %v1287_v54  ;;  %v1296_v60 = vrot.slane %v1279_v57, %v1295_v55  ;;  %v1284_v61 = vrot.slane %v1279_v57, %v1283_v56  ;;  %v1311_v13 = vsub.s32 7, %v2776_v30  ;;  %s1920_s14 = sshll.u32 %s2667_s11, 4  ;;  %s1921_s14 = int_to_ptr.vmem [resolvable:$true] %s1920_s14 }
 0x336   :  { %v1292_v62 = vrot.slane %v1279_v57, %v1291_v58  ;;  %v1300_v15 = vrot.slane %v1279_v57, %v1299_v8  ;;  %v1308_v16 = vrot.slane %v1279_v57, %v1307_v9  ;;  %v1304_v18 = vrot.slane %v1279_v57, %v1303_v12  ;;  %s2617_s26 = scalar_lea.vmem %s1921_s14, 128  ;;  %p2622_p4 = scmp.lt.s32.totalorder %s1921_s14, %s1921_s14 }
 0x337   :  { %v1312_v19 = vrot.slane %v1279_v57, %v1311_v13  ;;  %v2666_v56 = vmov 1966171168   ;;  %p2618_p3 = scmp.ne.s32.totalorder %s1921_s14, %s2617_s26  ;;  %p2623_p5 = scmp.lt.s32.totalorder %s2617_s26, %s2617_s26 }
 0x338   :  { %v1866_v57 = vunpack.c.l.s4 %v2666_v56 }
 0x339   :  { %p2624_p6 = por %p2623_p5, %p2622_p4 }
 0x33b   :  { %p2625_p7 = pnand %p2624_p6, %p2618_p3 }
 0x3c6   :  { %v1675_v46 = vpop.f32.mrf.mxu1  ;;  %v1716_v47 = vpop.f32.mrf.mxu0 }
 0x3c7   :  { %v1676_v1 = vadd.f32 %v1675_v46, %v1284_v61  ;;  %v1717_v2 = vadd.f32 %v1716_v47, %v1292_v62 }
 0x3c8   :  { %v1677_v48 = vpop.f32.mrf.mxu1  ;;  %v1718_v49 = vpop.f32.mrf.mxu0 }
 0x3c9   :  { %v1678_v63 = vadd.f32 %v1677_v48, %v1288_v59  ;;  %v1719_v0 = vadd.f32 %v1718_v49, %v1296_v60  ;;  %v1805_v5 = vsub.f32 0.0, %v1676_v1  ;;  %v1807_v6 = vsub.f32 0.0, %v1717_v2 }
 0x3ca   :  { %v1679_v50 = vpop.f32.mrf.mxu1  ;;  %v1720_v51 = vpop.f32.mrf.mxu0  ;;  %v1867_v59 = vunpack.c.0.s8 %v1866_v57 }
 0x3cb   :  { %v1806_v3 = vsub.f32 0.0, %v1678_v63  ;;  %v1808_v4 = vsub.f32 0.0, %v1719_v0  ;;  %v1813_v11 = vmul.f32 1.442695, %v1805_v5  ;;  %v1817_v14 = vmul.f32 1.442695, %v1807_v6 }
 0x3cc   :  { %v1680_v52 = vpop.f32.mrf.mxu1  ;;  %v1721_v53 = vpop.f32.mrf.mxu0  ;;  %v1870_v1 = vsub.s32 %v1867_v59, %v2776_v30 }
 0x3cd   :  { %v1815_v7 = vmul.f32 1.442695, %v1806_v3  ;;  %v1819_v10 = vmul.f32 1.442695, %v1808_v4 }
 0x3cf   :  { %2405 = vpow2.f32 %v1815_v7 }
 0x3d0   :  { %2407 = vpow2.f32 %v1819_v10 }
 0x3d1   :  { %2409 = vpow2.f32 %v1813_v11 }
 0x3d2   :  { %2411 = vpow2.f32 %v1817_v14 }
 0x3dc   :  { %v2406_v40 = vpop.eup %2405 }
 0x3dd   :  { %v2408_v41 = vpop.eup %2407  ;;  %v1830_v44 = vadd.f32 1.0, %v2406_v40 }
 0x3de   :  { %v2410_v42 = vpop.eup %2409  ;;  %v1832_v45 = vadd.f32 1.0, %v2408_v41 }
 0x3df   :  { %v2412_v43 = vpop.eup %2411  ;;  %v1829_v46 = vadd.f32 1.0, %v2410_v42 }
 0x3e0   :  { %v1831_v47 = vadd.f32 1.0, %v2412_v43 }
 0x3e6   :  { %v1757_v21 = vpop.f32.mrf.mxu1  ;;  %v1798_v17 = vpop.f32.mrf.mxu0 }
 0x3e7   :  { %v1758_v20 = vadd.f32 %v1757_v21, %v1300_v15  ;;  %v1799_v22 = vadd.f32 %v1798_v17, %v1308_v16 }
 0x3e8   :  { %v1759_v23 = vpop.f32.mrf.mxu1  ;;  %v1800_v24 = vpop.f32.mrf.mxu0 }
 0x3e9   :  { %v1809_v25 = vsub.f32 0.0, %v1758_v20  ;;  %v1811_v26 = vsub.f32 0.0, %v1799_v22  ;;  %v1760_v27 = vadd.f32 %v1759_v23, %v1304_v18  ;;  %v1801_v28 = vadd.f32 %v1800_v24, %v1312_v19 }
 0x3ea   :  { %v1761_v29 = vpop.f32.mrf.mxu1  ;;  %v1802_v31 = vpop.f32.mrf.mxu0 }
 0x3eb   :  { %v1821_v32 = vmul.f32 1.442695, %v1809_v25  ;;  %v1825_v33 = vmul.f32 1.442695, %v1811_v26  ;;  %v1810_v34 = vsub.f32 0.0, %v1760_v27  ;;  %v1812_v35 = vsub.f32 0.0, %v1801_v28 }
 0x3ec   :  { %v1762_v36 = vpop.f32.mrf.mxu1  ;;  %v1803_v37 = vpop.f32.mrf.mxu0 }
 0x3ed   :  { %2413 = vpow2.f32 %v1821_v32  ;;  %v1823_v38 = vmul.f32 1.442695, %v1810_v34  ;;  %v1827_v39 = vmul.f32 1.442695, %v1812_v35 }
 0x3ee   :  { %2415 = vpow2.f32 %v1825_v33 }
 0x3ef   :  { %2417 = vpow2.f32 %v1823_v38 }
 0x3f0   :  { %2419 = vpow2.f32 %v1827_v39 }
 0x3f1   :  { %2421 = vrcp.f32 %v1830_v44 }
 0x3f2   :  { %2423 = vrcp.f32 %v1832_v45 }
 0x3f3   :  { %2425 = vrcp.f32 %v1829_v46 }
 0x3f4   :  { %2427 = vrcp.f32 %v1831_v47 }
 0x3fa   :  { %v2414_v48 = vpop.eup %2413 }
 0x3fb   :  { %v2416_v49 = vpop.eup %2415  ;;  %v1833_v50 = vadd.f32 1.0, %v2414_v48 }
 0x3fc   :  { %v2418_v51 = vpop.eup %2417  ;;  %v1835_v52 = vadd.f32 1.0, %v2416_v49 }
 0x3fd   :  { %v2420_v53 = vpop.eup %2419  ;;  %2429 = vrcp.f32 %v1833_v50  ;;  %v1834_v54 = vadd.f32 1.0, %v2418_v51 }
 0x3fe   :  { %2431 = vrcp.f32 %v1835_v52  ;;  %v1836_v55 = vadd.f32 1.0, %v2420_v53  ;;  %v2422_v58 = vpop.eup %2421 }
 0x3ff   :  { %2433 = vrcp.f32 %v1834_v54  ;;  %v2424_v60 = vpop.eup %2423 }
 0x400   :  { %2435 = vrcp.f32 %v1836_v55  ;;  %v2426_v61 = vpop.eup %2425 }
 0x401   :  { %v2428_v62 = vpop.eup %2427  ;;  %v2115_v63 = vpack.c.bf16 %v2422_v58, %v2426_v61 }
 0x402   :  { %v2116_v0 = vpack.c.bf16 %v2424_v60, %v2428_v62 }
 0x403   :  { %v1871_v5 = vrot.slane %v2115_v63, %v1870_v1 }
 0x404   :  { %v1878_v6 = vrot.slane %v2116_v0, %v1870_v1 }
 0x406   :  { %v1893_v12 = vcombine.low %v1871_v5, %v1878_v6 }
 0x408   :  { %v1901_v14 = vrot.slane %v1893_v12, %v1870_v1 }
 0x40a   :  { %v2430_v2 = vpop.eup %2429 }
 0x40b   :  { %v2432_v3 = vpop.eup %2431 }
 0x40c   :  { %v2434_v4 = vpop.eup %2433 }
 0x40d   :  { %v2436_v7 = vpop.eup %2435  ;;  %v2117_v8 = vpack.c.bf16 %v2434_v4, %v2430_v2 }
 0x40e   :  { %v2118_v9 = vpack.c.bf16 %v2436_v7, %v2432_v3 }
 0x40f   :  { %v1885_v10 = vrot.slane %v2117_v8, %v1870_v1 }
 0x410   :  { %v1892_v11 = vrot.slane %v2118_v9, %v1870_v1 }
 0x412   :  { %v1894_v13 = vcombine.low %v1885_v10, %v1892_v11 }
 0x414   :  { %v1908_v15 = vrot.slane %v1894_v13, %v1870_v1 }
 0x416   :  { %v1909_v16 = vcombine.low %v1901_v14, %v1908_v15 }
 0x418   :  { %1911 = vst [vmem:[#allocation14] sm:$0xff] %v1909_v16 }
 0x419   :  { %2628 = shalt.err (!%p2625_p7)
}
 0x41a   :  { %1923 = dma.vmem_to_hbm [thread:$0]  %s1921_s14, 128, %s2877_s12, [#allocation4]  }
 0x41b   :  { %2645 = dma.done.wait [#allocation4], 128  }
 0x41c   :  { %2646 = vsyncadd [#allocation4], 4294967168 }
 0x41d   :  { %2647 = dma.done.wait [#allocation16], 64  }
 0x41e   :  { %2648 = vsyncadd [#allocation16], 4294967232 }
 0x41f   :  { %1953 = vsyncpa [#allocation3], 1 }
 0x420   :  { %1954 = vsyncpa [#allocation6], 1 }
 0x421   :  { %1955 = vsyncpa [#allocation9], 1 }
 0x422   :  { %1956 = vsyncpa [#allocation12], 1 }
 0x423   :  { %1957 = vsyncpa [#allocation4], 1 }
 0x424   :  { %1958 = vsyncpa [#allocation16], 1 }

</bundles_post_ra>
